<compile_context>
chip_gen: v7x
topology: tpu7x:2x2x1
jax: 0.10.0
libtpu: 0.0.40
codegen_flags: <defaults>
</compile_context>

<pallas_src>
import functools
import math

import jax
import jax.numpy as jnp
from jax import lax
from jax.experimental import pallas as pl
from jax.experimental.pallas import tpu as pltpu


def bert_self_output_kernel(x_ref, res_ref, wt_ref, params_ref, o_ref, *,
                            eps, precision):
    # x_ref / res_ref: (tm, H) native dtype
    # wt_ref:          (H_in, H_out)  -- already transposed in the wrapper
    # params_ref:      (3, H) f32     -- rows: dense bias, LN gamma, LN beta

    # Dense: x @ W.T  (== x @ wt).  MXU runs in the native input dtype with
    # f32 accumulation; standard (1,0) contraction, no in-kernel transpose.
    y = jnp.dot(x_ref[...], wt_ref[...],
                preferred_element_type=jnp.float32,
                precision=precision)

    # TODO(synk): dropout omitted (identity in eval mode; training-time dropout
    # would need pltpu.prng_* masking here).

    params = params_ref[...]                      # (3, H) f32, loaded once
    bias = params[0:1, :]
    gamma = params[1:2, :]
    beta = params[2:3, :]

    # Dense bias + residual add on the f32 accumulator.
    z = y + bias + res_ref[...].astype(jnp.float32)

    # LayerNorm over the last dim -- single-pass moments in f32
    # (E[z^2] - E[z]^2, clamped at 0 for safety).
    mean = jnp.mean(z, axis=-1, keepdims=True)
    meansq = jnp.mean(z * z, axis=-1, keepdims=True)
    var = jnp.maximum(meansq - mean * mean, 0.0)
    out = (z - mean) * lax.rsqrt(var + eps) * gamma + beta

    o_ref[...] = out.astype(o_ref.dtype)


def _round_up(x, m):
    return ((x + m - 1) // m) * m


def _vmem_plan():
    """Generation-aware (vmem_limit_bytes, max row tile)."""
    vmem_bytes = 64 * 1024 * 1024  # conservative default: v7x-class (64 MiB/TC)
    try:
        info = pltpu.get_tpu_info()
        vmem_bytes = int(getattr(info, "vmem_capacity_bytes", vmem_bytes))
    except Exception:
        # Hardware query unavailable on this runtime -> keep the conservative
        # (v7x-safe) default.  This only affects the tile-size heuristic.
        pass
    if vmem_bytes >= 96 * 1024 * 1024:
        # v5e / v6e: 128 MiB VMEM per TensorCore.
        return 96 * 1024 * 1024, 2048
    # v7x: 64 MiB VMEM per TensorCore -- leave headroom for f32 LN temporaries.
    return 48 * 1024 * 1024, 1024


def bert_self_output(hidden_states, input_tensor, dense_w, dense_b,
                     ln_w, ln_b, *, eps=1e-12, tm=None, precision=None):
    """hidden_states, input_tensor: [..., H]; dense_w: [H_out, H_in] (torch layout).

    `precision` is forwarded to the MXU matmul; pass lax.Precision.HIGHEST for
    exact-f32 production models (default TPU f32 matmul is reduced precision).
    """
    *lead, H = hidden_states.shape
    M = math.prod(lead) if lead else 1
    x = hidden_states.reshape(M, H)
    res = input_tensor.reshape(M, H)

    # One-time wrapper transpose: torch [out, in] -> [in, out], cast to the
    # activation dtype so the MXU runs in the native dtype.
    w_t = jnp.transpose(dense_w).astype(hidden_states.dtype)

    # Pack dense bias / LN gamma / LN beta into one (3, H) f32 constant block.
    params = jnp.stack([dense_b.astype(jnp.float32),
                        ln_w.astype(jnp.float32),
                        ln_b.astype(jnp.float32)], axis=0)

    vmem_limit, tm_cap = _vmem_plan()
    if tm is None:
        tm = tm_cap

    # Row tile: sublane-aligned (multiple of 8), capped by the generation-aware
    # limit, and never larger than needed for small M.  Ragged M is handled by
    # pl.cdiv + Pallas padding / masked writeback of the final tile.
    tm_eff = min(tm, tm_cap, _round_up(M, 8))
    # v7x megacore: the "parallel" grid axis shards across the 2 TensorCores,
    # so make sure there are at least 2 tiles whenever M is big enough.
    if pl.cdiv(M, tm_eff) < 2 and M >= 16:
        tm_eff = max(8, _round_up(pl.cdiv(M, 2), 8))

    kernel = functools.partial(bert_self_output_kernel, eps=eps,
                               precision=precision)
    out = pl.pallas_call(
        kernel,
        out_shape=jax.ShapeDtypeStruct((M, H), hidden_states.dtype),
        grid_spec=pltpu.PrefetchScalarGridSpec(
            num_scalar_prefetch=0,
            grid=(pl.cdiv(M, tm_eff),),
            in_specs=[
                pl.BlockSpec((tm_eff, H), lambda i: (i, 0)),   # x tile
                pl.BlockSpec((tm_eff, H), lambda i: (i, 0)),   # residual tile
                pl.BlockSpec((H, H), lambda i: (0, 0)),        # W.T (resident)
                pl.BlockSpec((3, H), lambda i: (0, 0)),        # bias/gamma/beta
            ],
            out_specs=pl.BlockSpec((tm_eff, H), lambda i: (i, 0)),
        ),
        compiler_params=pltpu.CompilerParams(
            dimension_semantics=("parallel",),
            vmem_limit_bytes=vmem_limit,
        ),
    )(x, res, w_t, params)

    return out.reshape(*lead, H)


def reference(hidden_states, input_tensor, dense_w, dense_b, ln_w, ln_b,
              eps=1e-12):
    y = jnp.einsum("...h,oh->...o", hidden_states, dense_w) + dense_b
    z = y + input_tensor
    mean = jnp.mean(z, axis=-1, keepdims=True)
    var = jnp.mean((z - mean) ** 2, axis=-1, keepdims=True)
    return (z - mean) * lax.rsqrt(var + eps) * ln_w + ln_b


if __name__ == "__main__":
    B, S, H = 2, 8, 32
    eps = 1e-12

    key = jax.random.PRNGKey(0)
    k1, k2, k3, k4, k5, k6 = jax.random.split(key, 6)

    hidden_states = jax.random.normal(k1, (B, S, H), dtype=jnp.float32)
    input_tensor = jax.random.normal(k2, (B, S, H), dtype=jnp.float32)

    # Deterministic parameter init (BertSelfOutput dense: H->H, LayerNorm over H).
    dense_w = jax.random.normal(k3, (H, H), dtype=jnp.float32) * 0.02  # torch [out, in]
    dense_b = jax.random.normal(k4, (H,), dtype=jnp.float32) * 0.02
    ln_w = 1.0 + 0.1 * jax.random.normal(k5, (H,), dtype=jnp.float32)
    ln_b = 0.1 * jax.random.normal(k6, (H,), dtype=jnp.float32)

    out = bert_self_output(hidden_states, input_tensor, dense_w, dense_b,
                           ln_w, ln_b, eps=eps)
    out = jax.block_until_ready(out)

    ref = reference(hidden_states, input_tensor, dense_w, dense_b, ln_w, ln_b,
                    eps=eps)
    assert out.shape == (B, S, H)
    assert jnp.allclose(out, ref, atol=1e-5, rtol=1e-5), "mismatch vs reference"

    print("KERNEL_OK")
</pallas_src>

<mosaic_0001>
module attributes {stable_mosaic.version = 11 : i64} {
  func.func @bert_self_output_kernel(%arg0: i32, %arg1: memref<8x32xf32, #tpu.memory_space<vmem>>, %arg2: memref<8x32xf32, #tpu.memory_space<vmem>>, %arg3: memref<32x32xf32, #tpu.memory_space<vmem>>, %arg4: memref<3x32xf32, #tpu.memory_space<vmem>>, %arg5: memref<8x32xf32, #tpu.memory_space<vmem>>) attributes {dimension_semantics = [#tpu.dimension_semantics<parallel>], iteration_bounds = array<i64: 2>, scalar_prefetch = 0 : i64, scratch_operands = 0 : i64, tpu.core_type = #tpu.core_type<tc>, window_params = [{transform_indices = @transform_0, window_bounds = array<i64: 8, 32>}, {transform_indices = @transform_1, window_bounds = array<i64: 8, 32>}, {pipeline_mode = #tpu.pipeline_mode<synchronous>, transform_indices = @transform_2, window_bounds = array<i64: 32, 32>}, {pipeline_mode = #tpu.pipeline_mode<synchronous>, transform_indices = @transform_3, window_bounds = array<i64: 3, 32>}, {transform_indices = @transform_4, window_bounds = array<i64: 8, 32>}]} {
    %c0 = arith.constant 0 : index
    %c0_0 = arith.constant 0 : index
    %0 = vector.load %arg1[%c0, %c0_0] : memref<8x32xf32, #tpu.memory_space<vmem>>, vector<8x32xf32>
    %c0_1 = arith.constant 0 : index
    %c0_2 = arith.constant 0 : index
    %1 = vector.load %arg3[%c0_1, %c0_2] : memref<32x32xf32, #tpu.memory_space<vmem>>, vector<32x32xf32>
    %cst = arith.constant dense<0.000000e+00> : vector<8x32xf32>
    %2 = tpu.matmul %0, %1, %cst {dimension_numbers = #tpu.dot_dimension_numbers<[1], [0], [0], [1], [0, 0, 1, 1], [], []>} : vector<8x32xf32>, vector<32x32xf32>, vector<8x32xf32> -> vector<8x32xf32>
    %c0_3 = arith.constant 0 : index
    %c0_4 = arith.constant 0 : index
    %3 = vector.load %arg4[%c0_3, %c0_4] : memref<3x32xf32, #tpu.memory_space<vmem>>, vector<3x32xf32>
    %4 = vector.extract_strided_slice %3 {offsets = [0, 0], sizes = [1, 32], strides = [1, 1]} : vector<3x32xf32> to vector<1x32xf32>
    %5 = vector.extract_strided_slice %3 {offsets = [1, 0], sizes = [1, 32], strides = [1, 1]} : vector<3x32xf32> to vector<1x32xf32>
    %6 = vector.extract_strided_slice %3 {offsets = [2, 0], sizes = [1, 32], strides = [1, 1]} : vector<3x32xf32> to vector<1x32xf32>
    %7 = vector.broadcast %4 : vector<1x32xf32> to vector<8x32xf32>
    %8 = arith.addf %2, %7 : vector<8x32xf32>
    %c0_5 = arith.constant 0 : index
    %c0_6 = arith.constant 0 : index
    %9 = vector.load %arg2[%c0_5, %c0_6] : memref<8x32xf32, #tpu.memory_space<vmem>>, vector<8x32xf32>
    %10 = arith.addf %8, %9 : vector<8x32xf32>
    %cst_7 = arith.constant dense<0.000000e+00> : vector<8xf32>
    %11 = vector.multi_reduction <add>, %10, %cst_7 [1] : vector<8x32xf32> to vector<8xf32>
    %12 = vector.shape_cast %11 : vector<8xf32> to vector<8x1xf32>
    %cst_8 = arith.constant 3.200000e+01 : f32
    %13 = vector.broadcast %cst_8 : f32 to vector<8x1xf32>
    %14 = arith.divf %12, %13 : vector<8x1xf32>
    %15 = arith.mulf %10, %10 : vector<8x32xf32>
    %cst_9 = arith.constant dense<0.000000e+00> : vector<8xf32>
    %16 = vector.multi_reduction <add>, %15, %cst_9 [1] : vector<8x32xf32> to vector<8xf32>
    %17 = vector.shape_cast %16 : vector<8xf32> to vector<8x1xf32>
    %cst_10 = arith.constant 3.200000e+01 : f32
    %18 = vector.broadcast %cst_10 : f32 to vector<8x1xf32>
    %19 = arith.divf %17, %18 : vector<8x1xf32>
    %20 = arith.mulf %14, %14 : vector<8x1xf32>
    %21 = arith.subf %19, %20 : vector<8x1xf32>
    %cst_11 = arith.constant 0.000000e+00 : f32
    %22 = vector.broadcast %cst_11 : f32 to vector<8x1xf32>
    %23 = arith.maximumf %21, %22 : vector<8x1xf32>
    %24 = vector.broadcast %14 : vector<8x1xf32> to vector<8x32xf32>
    %25 = arith.subf %10, %24 : vector<8x32xf32>
    %cst_12 = arith.constant 9.99999996E-13 : f32
    %26 = vector.broadcast %cst_12 : f32 to vector<8x1xf32>
    %27 = arith.addf %23, %26 : vector<8x1xf32>
    %28 = math.rsqrt %27 : vector<8x1xf32>
    %29 = vector.broadcast %28 : vector<8x1xf32> to vector<8x32xf32>
    %30 = arith.mulf %25, %29 : vector<8x32xf32>
    %31 = vector.broadcast %5 : vector<1x32xf32> to vector<8x32xf32>
    %32 = arith.mulf %30, %31 : vector<8x32xf32>
    %33 = vector.broadcast %6 : vector<1x32xf32> to vector<8x32xf32>
    %34 = arith.addf %32, %33 : vector<8x32xf32>
    %c0_13 = arith.constant 0 : index
    %c0_14 = arith.constant 0 : index
    %35 = vector.load %arg5[%c0_13, %c0_14] : memref<8x32xf32, #tpu.memory_space<vmem>>, vector<8x32xf32>
    tpu.vector_store %arg5[%c0_13, %c0_14], %34 {strides = array<i32>} : memref<8x32xf32, #tpu.memory_space<vmem>>, vector<8x32xf32>,
    return
  }
  func.func @transform_0(%arg0: i32) -> (i32, i32) {
    %c0_i32 = arith.constant 0 : i32
    %c0_i32_0 = arith.constant 0 : i32
    return %arg0, %c0_i32 : i32, i32
  }
  func.func @transform_1(%arg0: i32) -> (i32, i32) {
    %c0_i32 = arith.constant 0 : i32
    %c0_i32_0 = arith.constant 0 : i32
    return %arg0, %c0_i32 : i32, i32
  }
  func.func @transform_2(%arg0: i32) -> (i32, i32) {
    %c0_i32 = arith.constant 0 : i32
    %c0_i32_0 = arith.constant 0 : i32
    %c0_i32_1 = arith.constant 0 : i32
    return %c0_i32, %c0_i32_0 : i32, i32
  }
  func.func @transform_3(%arg0: i32) -> (i32, i32) {
    %c0_i32 = arith.constant 0 : i32
    %c0_i32_0 = arith.constant 0 : i32
    %c0_i32_1 = arith.constant 0 : i32
    return %c0_i32, %c0_i32_0 : i32, i32
  }
  func.func @transform_4(%arg0: i32) -> (i32, i32) {
    %c0_i32 = arith.constant 0 : i32
    %c0_i32_0 = arith.constant 0 : i32
    return %arg0, %c0_i32 : i32, i32
  }
}

</mosaic_0001>

<bundles_post_ra>
// kernel: tpu_custom_call.1
= control target key start
LH: loop header
LB: loop body
LE: loop exit
PB: predicated region body
PF: predicated region fallthrough
CT: control target
= control target key end

     0   :  { %s1043_s0 = inlined_call_operand.hbm [shape: f32[16,32], index: 0, kind: input, shape index: {}]   ;;  %s1044_s1 = inlined_call_operand.hbm [shape: f32[16,32], index: 1, kind: input, shape index: {}]   ;;  %s1045_s2 = inlined_call_operand.hbm [shape: f32[32,32], index: 2, kind: input, shape index: {}]   ;;  %s1046_s3 = inlined_call_operand.vmem [shape: f32[3,32], index: 3, kind: input, shape index: {}]   ;;  %s1047_s4 = inlined_call_operand.hbm [shape: f32[16,32], index: 4, kind: output, shape index: {}]  }
   0x1   :  { %1052 = sst [smem:[#allocation13_spill]] %s1045_s2 }
   0x2   :  { %9 = vsyncpa [#allocation3], 0 }
   0x3   :  { %11 = vsyncpa [#allocation3 + $0x1], 0 }
   0x4   :  { %12 = vsyncpa [#allocation6], 0 }
   0x5   :  { %14 = vsyncpa [#allocation6 + $0x1], 0 }
   0x6   :  { %15 = vsyncpa [#allocation4], 0 }
   0x7   :  { %17 = vsyncpa [#allocation4 + $0x1], 0  ;;  %s801_s15 = smov 0   ;;  %s803_s16 = smov 0  }
   0x8   :  { %s805_s17 = smov 0   ;;  %s807_s18 = smov 0  }
   0x9 LB: > { %s822_s19 = sadd.s32 4294967295, %s765_s18   ;;  %s494_s20 = sadd.s32 4294967294, %s765_s18   ;;  %s765_s18 = sphi %s807_s18, %s1071_s18   ;;  %s761_s17 = sphi %s805_s17, %s1070_s17   ;;  %s757_s16 = sphi %s803_s16, %s1069_s16   ;;  %s753_s15 = sphi %s801_s15, %s1068_s15  }
   0xa   : > { %p43_p0 = scmp.ne.s32.totalorder %s757_s16, %s753_s15  ;;  %p1048_p1 = scmp.eq.s32.totalorder %s822_s19, 0 }
   0xb   : > { %p141_p3 = scmp.eq.s32.totalorder %s494_s20, 1  ;;  %p495_p5 = scmp.ge.s32.totalorder %s765_s18, 1 }
   0xc   : > { %p831_p4 = por %p1048_p1, %p43_p0  ;;  %p148_p7 = scmp.lt.s32.totalorder %s765_s18, 3 }
   0xd   : > { %p836_p6 = por %p141_p3, %p43_p0  ;;  %s767_s24 = smov [#allocation7]  }
   0xe   : > { %s1053_s21 = scalar_select %p831_p4, 1, 0 }
   0xf   : > { %s1054_s22 = scalar_select %p836_p6, 1, 0 }
  0x10   : > { %p841_p8 = pnand %p495_p5, %p148_p7  ;;  %s160_s25 = sshll.u32 %s767_s24, 4  ;;  %s845_s25 = int_to_ptr.vmem [resolvable:$true] %s160_s25 }
  0x11   : > { %s857_s27 = sadd.s32 1, %s765_s18   ;;  %s30_s28 = sadd.s32 1, %s761_s17 }
  0x12   : > { %s1055_s23 = scalar_select %p841_p8, 1, 0 }
  0x13   : > { %p544_p9 = pneg %p841_p8  ;;  %s27_s29 = ssub.s32 %s765_s18, %s857_s27 }
  0x14   : > { %s1057_s2 = sld [smem:[#allocation13_spill]] }
  0x15   : > { %p852_p11 = pnand %p544_p9, %p1048_p1 }
  0x17   : > { %p605_p13 = pneg %p852_p11 }
  0x1a   : > { %s603_s6 = scalar_lea.hbm %s1057_s2, 512 }
  0x1b   : > { %p604_p12 = scmp.ne.s32.totalorder %s1057_s2, %s603_s6  ;;  %p610_p5 = scmp.lt.u32.totalorder %s603_s6, %s1057_s2 }
  0x1d   : > { %p606_p0 = pnand %p605_p13, %p604_p12 }
  0x1f   : > { %p607_p3 = pneg %p606_p0 }
  0x21   : > { %p612_p7 = pnand %p610_p5, %p607_p3 }
  0x23   : > { %615 = shalt.err (!%p612_p7)
}
  0x24   : > { %s616_s11 = scalar_lea.vmem %s845_s25, 512  ;;  %p624_p2 = scmp.lt.s32.totalorder %s845_s25, %s845_s25 }
  0x25   : > { %p617_p9 = scmp.ne.s32.totalorder %s845_s25, %s616_s11  ;;  %p625_p6 = scmp.lt.s32.totalorder %s616_s11, %s616_s11 }
  0x27   : > { %p619_p10 = pnand %p617_p9, %p605_p13  ;;  %p626_p4 = por %p625_p6, %p624_p2 }
  0x29   : > { %p620_p1 = pneg %p619_p10 }
  0x2b   : > { %p627_p8 = pnand %p626_p4, %p620_p1 }
  0x2d   : > { %630 = shalt.err (!%p627_p8)
}
  0x2e   : > { %s768_s12 = smov 128   ;;  %s769_s13 = smov 8  }
  0x2f   : > { %547 = dma.hbm_to_vmem [thread:$0]  (!%p852_p11), %s1057_s2, 512, %s845_s25, [#allocation6], %s768_s12, %s768_s12, %s769_s13  }
  0x30   : > { %p28_p2 = scmp.eq.s32.totalorder %s27_s29, 0  ;;  %p37_p1 = scmp.ne.s32.totalorder %s761_s17, %s757_s16 }
  0x31   : > { %p38_p4 = scmp.eq.s32.totalorder %s765_s18, 0  ;;  %p560_p6 = scmp.lt.s32.totalorder %s765_s18, 2 }
  0x32   : > { %s888_s24 = scalar_select %p28_p2, %s761_s17, %s30_s28  }
  0x33   : > { %p39_p8 = por %p38_p4, %p37_p1  ;;  %p1058_p10 = scmp.eq.s32.totalorder %s822_s19, 1 }
  0x34   : > { %s177_s5 = sand.u32 1, %s761_s17   ;;  %s499_s6 = sshll.u32 %s765_s18, 7 }
  0x35   : > { %p892_p12 = por %p1058_p10, %p37_p1  ;;  %s898_s7 = sshll.u32 %s177_s5, 3 }
  0x36   : > { %s903_s25 = scalar_lea.hbm %s1043_s0, %s499_s6  ;;  %s181_s28 = scalar_lea.vmem [#allocation2], %s898_s7 }
  0x37   : > { %s1059_s30 = scalar_select %p892_p12, 1, 0 }
  0x38   : > { %s188_s29 = sshll.u32 %s181_s28, 4  ;;  %p906_p11 = pnand %p560_p6, %p39_p8  ;;  %s910_s29 = int_to_ptr.vmem [resolvable:$true] %s188_s29 }
  0x39   : > { %s915_s12 = scalar_lea.hbm %s1044_s1, %s499_s6  ;;  %s178_s13 = scalar_lea.sflag [#allocation3], %s177_s5 }
  0x3a   : > { %s631_s14 = scalar_lea.hbm %s903_s25, 128  ;;  %p633_p0 = pneg %p906_p11 }
  0x3b   : > { %p632_p13 = scmp.ne.s32.totalorder %s903_s25, %s631_s14  ;;  %s636_s8 = scalar_lea.hbm %s1043_s0, 256 }
  0x3c   : > { %p637_p7 = scmp.lt.u32.totalorder %s903_s25, %s1043_s0  ;;  %p638_p9 = scmp.lt.u32.totalorder %s636_s8, %s631_s14 }
  0x3d   : > { %p634_p3 = pnand %p633_p0, %p632_p13  ;;  %p640_p1 = scmp.lt.u32.totalorder %s631_s14, %s903_s25 }
  0x3e   : > { %p639_p2 = por %p638_p9, %p637_p7 }
  0x3f   : > { %p635_p5 = pneg %p634_p3 }
  0x40   : > { %p641_p4 = por %p640_p1, %p639_p2 }
  0x42   : > { %p642_p6 = pnand %p641_p4, %p635_p5 }
  0x44   : > { %645 = shalt.err (!%p642_p6)
}
  0x45   : > { %s646_s5 = scalar_lea.vmem %s910_s29, 128  ;;  %s770_s6 = smov [#allocation2]  }
  0x46   : > { %p647_p8 = scmp.ne.s32.totalorder %s910_s29, %s646_s5  ;;  %s651_s10 = sshll.u32 %s770_s6, 4  ;;  %s652_s10 = int_to_ptr.vmem [resolvable:$false] %s651_s10 }
  0x47   : > { %s653_s2 = scalar_lea.vmem %s652_s10, 256  ;;  %p654_p3 = scmp.lt.s32.totalorder %s910_s29, %s652_s10 }
  0x48   : > { %p649_p10 = pnand %p647_p8, %p633_p0  ;;  %p655_p7 = scmp.lt.s32.totalorder %s653_s2, %s646_s5 }
  0x4a   : > { %p650_p13 = pneg %p649_p10  ;;  %p656_p9 = por %p655_p7, %p654_p3 }
  0x4c   : > { %p657_p2 = pnand %p656_p9, %p650_p13 }
  0x4e   : > { %660 = shalt.err (!%p657_p2)
}
  0x4f   : > { %551 = dma.hbm_to_vmem [thread:$0]  (!%p906_p11), %s903_s25, 128, %s910_s29, %s178_s13  }
  0x50   : > { %s195_s11 = sand.u32 1, %s765_s18   ;;  %s199_s14 = scalar_lea.vmem [#allocation5], %s898_s7 }
  0x51   : > { %s206_s20 = sshll.u32 %s199_s14, 4  ;;  %s196_s26 = scalar_lea.sflag [#allocation6], %s195_s11  ;;  %s207_s20 = int_to_ptr.vmem [resolvable:$true] %s206_s20 }
  0x52   : > { %s661_s8 = scalar_lea.hbm %s915_s12, 128  ;;  %s666_s6 = scalar_lea.hbm %s1044_s1, 256 }
  0x53   : > { %p662_p5 = scmp.ne.s32.totalorder %s915_s12, %s661_s8  ;;  %p667_p6 = scmp.lt.u32.totalorder %s915_s12, %s1044_s1 }
  0x54   : > { %p668_p8 = scmp.lt.u32.totalorder %s666_s6, %s661_s8  ;;  %p670_p13 = scmp.lt.u32.totalorder %s661_s8, %s915_s12 }
  0x55   : > { %p664_p1 = pnand %p662_p5, %p633_p0 }
  0x56   : > { %p669_p10 = por %p668_p8, %p667_p6 }
  0x57   : > { %p665_p4 = pneg %p664_p1 }
  0x58   : > { %p671_p3 = por %p670_p13, %p669_p10 }
  0x5a   : > { %p672_p7 = pnand %p671_p3, %p665_p4 }
  0x5c   : > { %675 = shalt.err (!%p672_p7)
}
  0x5d   : > { %s676_s7 = scalar_lea.vmem %s207_s20, 128  ;;  %s771_s25 = smov [#allocation5]  }
  0x5e   : > { %p677_p9 = scmp.ne.s32.totalorder %s207_s20, %s676_s7  ;;  %s681_s29 = sshll.u32 %s771_s25, 4  ;;  %s682_s29 = int_to_ptr.vmem [resolvable:$false] %s681_s29 }
  0x5f   : > { %s683_s13 = scalar_lea.vmem %s682_s29, 256  ;;  %p684_p1 = scmp.lt.s32.totalorder %s207_s20, %s682_s29 }
  0x60   : > { %p679_p2 = pnand %p677_p9, %p633_p0  ;;  %p685_p12 = scmp.lt.s32.totalorder %s683_s13, %s676_s7 }
  0x62   : > { %p680_p5 = pneg %p679_p2  ;;  %p686_p6 = por %p685_p12, %p684_p1 }
  0x64   : > { %p687_p8 = pnand %p686_p6, %p680_p5 }
  0x66   : > { %690 = shalt.err (!%p687_p8)
}
  0x67   : > { %554 = dma.hbm_to_vmem [thread:$0]  (!%p906_p11), %s915_s12, 128, %s207_s20, %s196_s26  }
  0x68   : > { %p1061_p4 = scmp.ne.s32.totalorder %s1055_s23, 0 }
  0x69   : > { %s966_s11 = sand.u32 (!%p1061_p4), 1, %s757_s16   ;;  %p1062_p12 = scmp.ne.s32.totalorder (!%p1061_p4), %s1053_s21, 0 }
  0x6a   : > { %215 = sbr.rel (%p1061_p4) target bundleno = 532 (0x214), region = 36  ;;  %s969_s14 = sshll.u32 (!%p1061_p4), %s966_s11, 3 }
  0x6b   : > { %s218_s8 = scalar_lea.sflag (!%p1061_p4), [#allocation3], %s966_s11  ;;  %s221_s28 = scalar_lea.vmem (!%p1061_p4), [#allocation2], %s969_s14 }
  0x71   : > { %736 = dma.done.wait (%p1062_p12), %s218_s8, 128  }
  0x72   : > { %738 = vsyncadd (%p1062_p12), %s218_s8, 4294967168  ;;  %s226_s23 = sand.u32 1, %s822_s19   ;;  %s230_s12 = scalar_lea.vmem [#allocation5], %s969_s14 }
  0x73   : > { %s227_s9 = scalar_lea.sflag [#allocation6], %s226_s23 }
  0x74   : > { %740 = dma.done.wait (%p1062_p12), %s227_s9, 128  }
  0x75   : > { %742 = vsyncadd (%p1062_p12), %s227_s9, 4294967168  ;;  %p1063_p11 = scmp.eq.s32.totalorder %s822_s19, 0 }
  0x77   : > { %744 = dma.done.wait (%p1063_p11), [#allocation6], 512   ;;  %p1064_p0 = pmov %p1063_p11 }
  0x78   : > { %v772_v0 = vmov 0.0|0.0   ;;  %vm773_vm0 = vmmov 0   ;;  %v774_v1 = vmov 0.0   ;;  %v265_v2 = vld [vmem:[#allocation7] sm:$0xff]  ;;  %v266_v3 = vld [vmem:[#allocation7 + $0x8] sm:$0xff]  ;;  %v267_v4 = vld [vmem:[#allocation7 + $0x10] sm:$0xff]  ;;  %v270_v9 = vlaneseq }
  0x79   : > { %746 = vsyncadd (%p1064_p0), [#allocation6], 4294966784  ;;  %528 = vmatprep.subr.bf16.mxu0 %v772_v0  ;;  %525 = vmatprep.mubr.msk.f32.mxu0 %vm773_vm0, %v774_v1  ;;  %v529_v5 = vpack.c.bf16 %v266_v3, %v265_v2  ;;  %v268_v6 = vld [vmem:[#allocation7 + $0x18] sm:$0xff]  ;;  %v264_v8 = vld [vmem:[%s221_s28] sm:$0xff]  ;;  %vm274_vm1 = vcmask 261120   ;;  %s509_s26 = sshll.u32 %s822_s19, 7 }
  0x7a   : > { %v532_v7 = vpack.c.bf16 %v268_v6, %v267_v4  ;;  %v271_v10 = vshrl.u32 %v270_v9, 7  ;;  %v269_v12 = vld [vmem:[%s1046_s3] sm:$0x7]  ;;  %v348_v15 = vld [vmem:[%s230_s12] sm:$0xff]  ;;  %s263_s5 = scalar_lea.vmem [#allocation8], %s969_s14  ;;  %s998_s7 = scalar_lea.hbm %s1047_s4, %s509_s26 }
  0x7b   : > { %530 = vmatpush3.bf16.msra.mxu0 %v529_v5  ;;  %s392_s6 = sshll.u32 %s263_s5, 4  ;;  %s379_s25 = scalar_lea.sflag [#allocation4], %s966_s11  ;;  %s1000_s6 = int_to_ptr.vmem [resolvable:$true] %s392_s6 }
  0x7c   : > { %531 = vmatprep.subr.bf16.mxu0 %v772_v0  ;;  %v272_v11 = vsub.s32 0, %v271_v10  ;;  %v369_v30 = vsub.s32 1, %v271_v10  ;;  %v374_v31 = vsub.s32 2, %v271_v10  ;;  %s691_s29 = scalar_lea.vmem %s1000_s6, 128  ;;  %p1065_p13 = scmp.ne.s32.totalorder %s1059_s30, 0 }
  0x7d   : > { %p692_p10 = scmp.ne.s32.totalorder %s1000_s6, %s691_s29  ;;  %s775_s19 = smov [#allocation8]  }
  0x7e   : > { %v273_v13 = vrot.slane %v269_v12, %v272_v11  ;;  %v370_v32 = vrot.slane %v269_v12, %v369_v30  ;;  %v375_v35 = vrot.slane %v269_v12, %v374_v31  ;;  %s695_s13 = sshll.u32 %s775_s19, 4  ;;  %s696_s13 = int_to_ptr.vmem [resolvable:$false] %s695_s13 }
  0x7f   : > { %533 = vmatpush3.bf16.msra.mxu0 %v532_v7  ;;  %p693_p3 = pnand %p692_p10, %p1065_p13  ;;  %s697_s14 = scalar_lea.vmem %s696_s13, 256 }
  0x80   : > { %p698_p9 = scmp.lt.s32.totalorder %s1000_s6, %s696_s13  ;;  %p699_p2 = scmp.lt.s32.totalorder %s697_s14, %s691_s29 }
  0x81   : > { %p694_p7 = pneg %p693_p3 }
  0x82   : > { %526 = vmatmul.mubr.msk.f32.vlgmr.msra.gmra.mrb[0].mxu0 %vm274_vm1, %v264_v8  ;;  %p700_p5 = por %p699_p2, %p698_p9 }
  0x84   : > { %p701_p1 = pnand %p700_p5, %p694_p7 }
 0x155   : > { %v344_v14 = vpop.f32.mrb[0].mxu0 }
 0x156   : > { %v345_v16 = vadd.f32 %v344_v14, %v273_v13  ;;  %v527_v17 = vpop.f32.mrb[1].mxu0 }
 0x158   : > { %v349_v18 = vadd.f32 %v348_v15, %v345_v16 }
 0x15a   : > { %v350_v19 = vsel %vm274_vm1, %v349_v18, 0.0  ;;  %v355_v20 = vmul.f32 %v349_v18, %v349_v18 }
 0x15b   : > { %351 = vadd.xlane.f32.xlu0 %v350_v19 }
 0x15c   : > { %v356_v21 = vsel %vm274_vm1, %v355_v20, 0.0 }
 0x15f   : > { %357 = vadd.xlane.f32.xlu0 %v356_v21 }
 0x1e8   : > { %v352_v22 = vpop.xlane.xlu0 %351 }
 0x1e9   : > { %v354_v23 = vmul.f32 0.03125, %v352_v22 }
 0x1eb   : > { %v360_v25 = vmul.f32 %v354_v23, %v354_v23  ;;  %v363_v33 = vsub.f32 %v349_v18, %v354_v23 }
 0x1ec   : > { %v358_v24 = vpop.xlane.xlu0 %357 }
 0x1ed   : > { %v359_v26 = vmul.f32 0.03125, %v358_v24 }
 0x1ef   : > { %v361_v27 = vsub.f32 %v359_v26, %v360_v25 }
 0x1f1   : > { %v362_v28 = vmax.f32 %v361_v27, 0.0 }
 0x1f3   : > { %v364_v29 = vadd.f32 1e-12, %v362_v28 }
 0x1f5   : > { %601 = vrsqrt.f32 %v364_v29 }
 0x1ff   : > { %v602_v34 = vpop.eup %601 }
 0x200   : > { %v366_v36 = vmul.f32 %v602_v34, %v363_v33 }
 0x202   : > { %v371_v37 = vmul.f32 %v370_v32, %v366_v36 }
 0x204   : > { %v376_v38 = vadd.f32 %v375_v35, %v371_v37 }
 0x206   : > { %377 = vst.msk [vmem:[%s263_s5] sm:$0xff] %vm274_vm1, %v376_v38 }
 0x207   : > { %704 = shalt.err (!%p701_p1)
}
 0x208   : > { %s705_s11 = scalar_lea.hbm %s998_s7, 128  ;;  %s709_s23 = scalar_lea.hbm %s1047_s4, 256 }
 0x209   : > { %p706_p6 = scmp.ne.s32.totalorder %s998_s7, %s705_s11  ;;  %p710_p12 = scmp.lt.u32.totalorder %s998_s7, %s1047_s4 }
 0x20a   : > { %p711_p11 = scmp.lt.u32.totalorder %s709_s23, %s705_s11  ;;  %p713_p10 = scmp.lt.u32.totalorder %s705_s11, %s998_s7 }
 0x20b   : > { %p707_p8 = pnand %p706_p6, %p1065_p13 }
 0x20c   : > { %p712_p0 = por %p711_p11, %p710_p12 }
 0x20d   : > { %p708_p4 = pneg %p707_p8 }
 0x20e   : > { %p714_p3 = por %p713_p10, %p712_p0 }
 0x210   : > { %p715_p7 = pnand %p714_p3, %p708_p4 }
 0x212   : > { %718 = shalt.err (!%p715_p7)
}
 0x213   : > { %542 = dma.vmem_to_hbm [thread:$0]  (%p1065_p13), %s1000_s6, 128, %s998_s7, %s379_s25  }
 0x214 PF: > { %s404_s21 = sand.u32 1, %s753_s15   ;;  %p1066_p9 = scmp.ne.s32.totalorder %s1054_s22, 0 }
 0x215   : > { %p1067_p2 = scmp.ge.s32.totalorder %s765_s18, 2  ;;  %s405_s20 = scalar_lea.sflag [#allocation4], %s404_s21 }
 0x217   : > { %p556_p5 = pnand %p1067_p2, %p1066_p9 }
 0x219   : > { %748 = dma.done.wait (!%p556_p5), %s405_s20, 128  }
 0x21a   : > { %750 = vsyncadd (!%p556_p5), %s405_s20, 4294967168  ;;  %p20_p1 = scmp.ge.s32.totalorder %s857_s27, 4   ;;  %s1068_s15 = smov %s757_s16 }
 0x21b   : > { %s1069_s16 = smov %s761_s17  ;;  %s1070_s17 = smov %s888_s24 }
 0x21c   : > { %s1071_s18 = smov %s857_s27  ;;  %22 = sbr.rel (!%p20_p1) target bundleno = 9 (0x9), region = 98 }
 0x223   :  { %410 = vsyncpa [#allocation3], 1 }
 0x224   :  { %412 = vsyncpa [#allocation3 + $0x1], 1 }
 0x225   :  { %413 = vsyncpa [#allocation6], 1 }
 0x226   :  { %415 = vsyncpa [#allocation6 + $0x1], 1 }
 0x227   :  { %416 = vsyncpa [#allocation4], 1 }
 0x228   :  { %418 = vsyncpa [#allocation4 + $0x1], 1 }

</bundles_post_ra>
